<compile_context>
chip_gen: v5e
topology: v5e:2x2
jax: 0.10.0
libtpu: 0.0.40
codegen_flags: <defaults>
</compile_context>

<pallas_src>
import functools

import numpy as np

import jax
import jax.numpy as jnp
from jax.experimental import pallas as pl
from jax.experimental.pallas import tpu as pltpu

_LANE = 128
_SUBLANE = 8


def _cdiv(a, b):
    return -(-a // b)


def _round_up(a, b):
    return _cdiv(a, b) * b


def _choose_lane_tiling(F, max_tf=2048):
    """Pick (TF, n_chunks, F_pad): lane-tile width (multiple of 128) and grid size.

    No forced multi-chunk split: single-TensorCore chips (v5e/v6e) get one big
    lane slab; v7x parallelism comes from the m-tile grid axis instead.
    """
    F_pad = max(_LANE, _round_up(F, _LANE))
    n_chunks = _cdiv(F_pad, max_tf)
    TF = _round_up(_cdiv(F_pad, n_chunks), _LANE)
    n_chunks = _cdiv(F_pad, TF)
    return TF, n_chunks, TF * n_chunks


def _choose_m_tiling(m, max_tm=512):
    """Pick (TM, n_mtiles, M_pad): output-row tile (multiple of 8) and grid size."""
    m_pad8 = max(_SUBLANE, _round_up(m, _SUBLANE))
    TM = min(max_tm, m_pad8)
    n_mtiles = _cdiv(m_pad8, TM)
    return TM, n_mtiles, TM * n_mtiles


def _newton_kernel(value_ref, xsprod_ref, invdx_ref, out_ref, *, ord, k):
    # value_ref : (K_pad, TF)         first ord+1 keypoint rows, batch*dim on lanes
    # xsprod_ref: (TM, K_pad)         Newton basis products (zero rows/cols past m/k)
    # invdx_ref : (ord_eff, K_pad, 1) reciprocal denominators 1/(x[j] - x[j+1+i])
    # out_ref   : (TM, TF)
    k_pad, tf = value_ref.shape

    d = value_ref[...].astype(jnp.float32)                   # (K_pad, TF)

    # Divided-difference recurrence over at most ord+1 rows; only row 0 of each
    # level is a coefficient.  Tiny VPU work (<= 8 sublanes per level).
    rows = [d[0:1, :]]                                        # c_0
    for i in range(ord):
        L = ord - i                                           # rows still needed
        d = (d[:L, :] - d[1:L + 1, :]) * invdx_ref[i, :L, :]
        rows.append(d[0:1, :])                                # c_{i+1}
    if k_pad > k:
        rows.append(jnp.zeros((k_pad - k, tf), jnp.float32))  # zero pad rows
    coeff = jnp.concatenate(rows, axis=0)                     # (K_pad, TF)

    # Tiny-K combine on the MXU (K = K_pad <= 8 typically); VALU stays free.
    out_ref[...] = jnp.dot(
        xsprod_ref[...].astype(jnp.float32), coeff,
        preferred_element_type=jnp.float32,
    ).astype(out_ref.dtype)


def newton_interpolation(index, value, ord, interval=1):
    """index: concrete (n,) int array; value: (..., n, dim).

    Returns interpolations of shape (..., m, dim) with m = index[-1] - index[0]
    (for interval=1), excluding the start point — identical to the PyTorch module.
    """
    x = np.asarray(index).astype(np.int64)
    n = int(x.shape[0])
    batch_shape = tuple(value.shape[:-2])
    n_v, dim = int(value.shape[-2]), int(value.shape[-1])
    assert n_v == n and 0 <= ord <= n - 1

    K = ord + 1                          # only the first ord+1 keypoints matter
    K_pad = max(_SUBLANE, _round_up(K, _SUBLANE))

    # ---- host-side glue (integer index arithmetic, static shapes) ----
    x_p = np.arange(x[0] + 1, x[-1] + 1, step=interval)                  # (m,)
    m = int(x_p.shape[0])
    TM, n_mtiles, M_pad = _choose_m_tiling(m)

    xs_prod = np.zeros((M_pad, K_pad), np.float32)                       # zero-padded
    xs_prod[:m, 0] = 1.0
    run = np.ones((m,), np.float64)
    for i in range(ord):
        run = run * (x_p.astype(np.float64) - float(x[i]))
        xs_prod[:m, i + 1] = run.astype(np.float32)

    ord_eff = max(ord, 1)                                  # avoid zero-sized input
    inv_dx = np.ones((ord_eff, K_pad, 1), np.float32)      # padded reciprocals
    for i in range(ord):
        L = K - 1 - i                                      # = ord - i
        inv_dx[i, :L, 0] = (
            1.0 / (x[:L] - x[1 + i:1 + i + L]).astype(np.float64)
        ).astype(np.float32)

    # ---- fold batch x dim onto lanes, keeping only the first ord+1 rows ----
    B = int(np.prod(batch_shape)) if batch_shape else 1
    F = B * dim
    TF, n_chunks, F_pad = _choose_lane_tiling(F)

    v = jnp.reshape(value, (B, n, dim))[:, :K, :]           # slice BEFORE relayout
    v = jnp.transpose(v, (1, 0, 2)).reshape(K, F)           # (K, F), native dtype
    v = jnp.pad(v, ((0, K_pad - K), (0, F_pad - F)))        # zero-pad rows & lanes

    out = pl.pallas_call(
        functools.partial(_newton_kernel, ord=ord, k=K),
        out_shape=jax.ShapeDtypeStruct((M_pad, F_pad), jnp.float32),
        grid_spec=pltpu.PrefetchScalarGridSpec(
            num_scalar_prefetch=0,
            # m innermost: value block index is constant across it (no re-DMA).
            grid=(n_chunks, n_mtiles),
            in_specs=[
                pl.BlockSpec((K_pad, TF), lambda fc, mi: (0, fc)),
                pl.BlockSpec((TM, K_pad), lambda fc, mi: (mi, 0)),
                pl.BlockSpec((ord_eff, K_pad, 1), lambda fc, mi: (0, 0, 0)),
            ],
            out_specs=pl.BlockSpec((TM, TF), lambda fc, mi: (mi, fc)),
        ),
        compiler_params=pltpu.CompilerParams(
            dimension_semantics=("parallel", "parallel"),
            vmem_limit_bytes=32 * 1024 * 1024,   # tiles use << this on all gens
        ),
    )(v, jnp.asarray(xs_prod), jnp.asarray(inv_dx))

    # Output relayout (kept f32 to match the module; could be emitted in the
    # input dtype to halve writeback if downstream tolerates it).
    out = out[:m, :F].reshape(m, B, dim)
    out = jnp.transpose(out, (1, 0, 2)).reshape(*batch_shape, m, dim)
    return out


def newton_ref(index, value, ord, interval=1):
    """Pure NumPy transcription of the PyTorch forward, for validation."""
    x = np.asarray(index).astype(np.int64)
    y = np.asarray(value).astype(np.float64)
    diff_quotient = [y]
    for i in range(ord):
        last = diff_quotient[i]
        diff_y = last[..., :-1, :] - last[..., 1:, :]
        diff_x = (x[:-1 - i] - x[1 + i:])[:, None]
        diff_quotient.append(diff_y / diff_x)
    x_p = np.arange(x[0] + 1, x[-1] + 1, step=interval)
    coe = np.stack([d[..., 0, :] for d in diff_quotient])        # (ord+1, B1, B2, dim)
    xs = x_p[:, None] - x
    cols = [np.ones_like(x_p)[:, None]]
    for i in range(ord):
        cols.append(np.prod(xs[:, :i + 1], axis=-1, keepdims=True))
    xs_prod = np.concatenate(cols, axis=-1).astype(np.float64)[None, None]
    coe = np.transpose(coe, [1, 2, 0, 3])                        # (B1, B2, ord+1, dim)
    return xs_prod @ coe                                         # (B1, B2, m, dim)


if __name__ == "__main__":
    # Small deterministic example (the module has no learnable parameters).
    B1, B2, n, dim = 2, 4, 8, 32
    ord_ = 3
    index = np.arange(n, dtype=np.int32) * 2      # keypoints at 0, 2, ..., 14 -> m = 14
    key = jax.random.PRNGKey(0)
    value = jax.random.normal(key, (B1, B2, n, dim), dtype=jnp.float32)

    out = newton_interpolation(index, value, ord_, interval=1)
    out = jax.block_until_ready(out)

    ref = newton_ref(index, np.asarray(value), ord_, interval=1)
    assert out.shape == ref.shape, (out.shape, ref.shape)
    np.testing.assert_allclose(np.asarray(out), ref, rtol=2e-2, atol=2e-2)
    print("KERNEL_OK")
</pallas_src>

<mosaic_0001>
module attributes {stable_mosaic.version = 11 : i64} {
  func.func @_newton_kernel(%arg0: i32, %arg1: i32, %arg2: memref<8x256xf32, #tpu.memory_space<vmem>>, %arg3: memref<16x8xf32, #tpu.memory_space<vmem>>, %arg4: memref<3x8x1xf32, #tpu.memory_space<vmem>>, %arg5: memref<16x256xf32, #tpu.memory_space<vmem>>) attributes {dimension_semantics = [#tpu.dimension_semantics<parallel>, #tpu.dimension_semantics<parallel>], iteration_bounds = array<i64: 1, 1>, scalar_prefetch = 0 : i64, scratch_operands = 0 : i64, tpu.core_type = #tpu.core_type<tc>, window_params = [{transform_indices = @transform_0, window_bounds = array<i64: 8, 256>}, {transform_indices = @transform_1, window_bounds = array<i64: 16, 8>}, {pipeline_mode = #tpu.pipeline_mode<synchronous>, transform_indices = @transform_2, window_bounds = array<i64: 3, 8, 1>}, {transform_indices = @transform_3, window_bounds = array<i64: 16, 256>}]} {
    %c0 = arith.constant 0 : index
    %c0_0 = arith.constant 0 : index
    %0 = vector.load %arg2[%c0, %c0_0] : memref<8x256xf32, #tpu.memory_space<vmem>>, vector<8x256xf32>
    %1 = vector.extract_strided_slice %0 {offsets = [0, 0], sizes = [1, 256], strides = [1, 1]} : vector<8x256xf32> to vector<1x256xf32>
    %2 = vector.extract_strided_slice %0 {offsets = [0, 0], sizes = [3, 256], strides = [1, 1]} : vector<8x256xf32> to vector<3x256xf32>
    %3 = vector.extract_strided_slice %0 {offsets = [1, 0], sizes = [3, 256], strides = [1, 1]} : vector<8x256xf32> to vector<3x256xf32>
    %4 = arith.subf %2, %3 : vector<3x256xf32>
    %c0_1 = arith.constant 0 : index
    %c0_2 = arith.constant 0 : index
    %c0_3 = arith.constant 0 : index
    %5 = vector.load %arg4[%c0_1, %c0_2, %c0_3] : memref<3x8x1xf32, #tpu.memory_space<vmem>>, vector<1x3x1xf32>
    %6 = vector.shape_cast %5 : vector<1x3x1xf32> to vector<3x1xf32>
    %7 = vector.broadcast %6 : vector<3x1xf32> to vector<3x256xf32>
    %8 = arith.mulf %4, %7 : vector<3x256xf32>
    %9 = vector.extract_strided_slice %8 {offsets = [0, 0], sizes = [1, 256], strides = [1, 1]} : vector<3x256xf32> to vector<1x256xf32>
    %10 = vector.extract_strided_slice %8 {offsets = [0, 0], sizes = [2, 256], strides = [1, 1]} : vector<3x256xf32> to vector<2x256xf32>
    %11 = vector.extract_strided_slice %8 {offsets = [1, 0], sizes = [2, 256], strides = [1, 1]} : vector<3x256xf32> to vector<2x256xf32>
    %12 = arith.subf %10, %11 : vector<2x256xf32>
    %c1 = arith.constant 1 : index
    %c0_4 = arith.constant 0 : index
    %c0_5 = arith.constant 0 : index
    %13 = vector.load %arg4[%c1, %c0_4, %c0_5] : memref<3x8x1xf32, #tpu.memory_space<vmem>>, vector<1x2x1xf32>
    %14 = vector.shape_cast %13 : vector<1x2x1xf32> to vector<2x1xf32>
    %15 = vector.broadcast %14 : vector<2x1xf32> to vector<2x256xf32>
    %16 = arith.mulf %12, %15 : vector<2x256xf32>
    %17 = vector.extract_strided_slice %16 {offsets = [0, 0], sizes = [1, 256], strides = [1, 1]} : vector<2x256xf32> to vector<1x256xf32>
    %18 = vector.extract_strided_slice %16 {offsets = [0, 0], sizes = [1, 256], strides = [1, 1]} : vector<2x256xf32> to vector<1x256xf32>
    %19 = vector.extract_strided_slice %16 {offsets = [1, 0], sizes = [1, 256], strides = [1, 1]} : vector<2x256xf32> to vector<1x256xf32>
    %20 = arith.subf %18, %19 : vector<1x256xf32>
    %c2 = arith.constant 2 : index
    %c0_6 = arith.constant 0 : index
    %c0_7 = arith.constant 0 : index
    %21 = vector.load %arg4[%c2, %c0_6, %c0_7] : memref<3x8x1xf32, #tpu.memory_space<vmem>>, vector<1x1x1xf32>
    %22 = vector.shape_cast %21 : vector<1x1x1xf32> to vector<1x1xf32>
    %23 = vector.broadcast %22 : vector<1x1xf32> to vector<1x256xf32>
    %24 = arith.mulf %20, %23 : vector<1x256xf32>
    %cst = arith.constant 0.000000e+00 : f32
    %25 = vector.broadcast %cst : f32 to vector<4x256xf32>
    %26 = tpu.concatenate %1, %9, %17, %24, %25 in 0 : vector<1x256xf32>, vector<1x256xf32>, vector<1x256xf32>, vector<1x256xf32>, vector<4x256xf32> -> vector<8x256xf32>
    %c0_8 = arith.constant 0 : index
    %c0_9 = arith.constant 0 : index
    %27 = vector.load %arg3[%c0_8, %c0_9] : memref<16x8xf32, #tpu.memory_space<vmem>>, vector<16x8xf32>
    %cst_10 = arith.constant dense<0.000000e+00> : vector<16x256xf32>
    %28 = tpu.matmul %27, %26, %cst_10 {dimension_numbers = #tpu.dot_dimension_numbers<[1], [0], [0], [1], [0, 0, 1, 1], [], []>} : vector<16x8xf32>, vector<8x256xf32>, vector<16x256xf32> -> vector<16x256xf32>
    %c0_11 = arith.constant 0 : index
    %c0_12 = arith.constant 0 : index
    %29 = vector.load %arg5[%c0_11, %c0_12] : memref<16x256xf32, #tpu.memory_space<vmem>>, vector<16x256xf32>
    tpu.vector_store %arg5[%c0_11, %c0_12], %28 {strides = array<i32>} : memref<16x256xf32, #tpu.memory_space<vmem>>, vector<16x256xf32>,
    return
  }
  func.func @transform_0(%arg0: i32, %arg1: i32) -> (i32, i32) {
    %c0_i32 = arith.constant 0 : i32
    %c0_i32_0 = arith.constant 0 : i32
    return %c0_i32, %arg0 : i32, i32
  }
  func.func @transform_1(%arg0: i32, %arg1: i32) -> (i32, i32) {
    %c0_i32 = arith.constant 0 : i32
    %c0_i32_0 = arith.constant 0 : i32
    return %arg1, %c0_i32 : i32, i32
  }
  func.func @transform_2(%arg0: i32, %arg1: i32) -> (i32, i32, i32) {
    %c0_i32 = arith.constant 0 : i32
    %c0_i32_0 = arith.constant 0 : i32
    %c0_i32_1 = arith.constant 0 : i32
    %c0_i32_2 = arith.constant 0 : i32
    return %c0_i32, %c0_i32_0, %c0_i32_1 : i32, i32, i32
  }
  func.func @transform_3(%arg0: i32, %arg1: i32) -> (i32, i32) {
    %c0_i32 = arith.constant 0 : i32
    return %arg1, %arg0 : i32, i32
  }
}

</mosaic_0001>

<bundles_post_ra>
// kernel: tpu_custom_call.1
= control target key start
LH: loop header
LB: loop body
LE: loop exit
PB: predicated region body
PF: predicated region fallthrough
CT: control target
= control target key end

     0   :  { %v212_v1 = vmov 0   ;;  %s260_s0 = inlined_call_operand.vmem [shape: f32[8,256], index: 0, kind: input, shape index: {}]   ;;  %s261_s1 = inlined_call_operand.vmem [shape: f32[16,8], index: 1, kind: input, shape index: {}]   ;;  %s262_s2 = inlined_call_operand.vmem [shape: f32[3,8,1], index: 2, kind: input, shape index: {}]   ;;  %s263_s3 = inlined_call_operand.hbm [shape: f32[16,256], index: 3, kind: output, shape index: {}]  }
   0x1   :  { %v25_v0 = vld [vmem:[%s262_s2] sm:$0x7]  ;;  %184 = vset.pattern.permute.xlu0 %v212_v1  ;;  %185 = vset.pattern.permute.xlu1 %v212_v1  ;;  %v171_v2 = vld [vmem:[%s262_s2 + $0x10] sm:$0x1] }
   0x2   :  { %8 = vsyncpa [#allocation3], 0  ;;  %28 = vperm.xlu0 %184, %v25_v0   ;;  %62 = vperm.xlu1 %185, %v171_v2   ;;  %v170_v3 = vld [vmem:[%s262_s2 + $0x8] sm:$0x3]  ;;  %v15_v4 = vld [vmem:[%s260_s0] sm:$0xff]  ;;  %vm81_vm0 = vcmask 1040384  }
   0x3   :  { %v16_v5 = vld [vmem:[%s260_s0 + $0x8] sm:$0xff]  ;;  %v19_v6 = vrot.slane %v15_v4, 1  ;;  %vm84_vm1 = vcmask 1041408   ;;  %vm87_vm2 = vcmask 1042432   ;;  %vm90_vm3 = vcmask 1043456   ;;  %v93_v40 = vld [vmem:[%s261_s1] sm:$0xff] }
   0x4   :  { %v20_v7 = vrot.slane %v16_v5, 1  ;;  %v94_v39 = vld [vmem:[%s261_s1 + $0x8] sm:$0xff]  ;;  %vm95_vm4 = vcmask 64512   ;;  %s213_s24 = smov [#allocation2]   ;;  %s158_s28 = sshll.u32 %s263_s3, 4  ;;  %s159_s28 = int_to_ptr.hbm [resolvable:$true] %s158_s28 }
   0x5   :  { %v23_v8 = vsub.f32 %v15_v4, %v19_v6  ;;  %s156_s25 = sshll.u32 %s213_s24, 4  ;;  %s214_s1 = smov 256   ;;  %s157_s25 = int_to_ptr.vmem [resolvable:$true] %s156_s25 }
   0x6   :  { %v24_v9 = vsub.f32 %v16_v5, %v20_v7  ;;  %s215_s29 = smov 16  }
   0xa   :  { %45 = vperm.xlu0 %184, %v170_v3  }
  0x74   :  { %v29_v10 = vpop.permute.xlu0 %28  ;;  %v63_v22 = vpop.permute.xlu1 %62 }
  0x75   :  { %v31_v11 = vmul.f32 %v29_v10, %v23_v8  ;;  %v32_v12 = vmul.f32 %v29_v10, %v24_v9 }
  0x77   :  { %v35_v13 = vrot.slane %v31_v11, 1  ;;  %v36_v14 = vrot.slane %v32_v12, 1  ;;  %v67_v23 = vrot.slane %v31_v11, 7  ;;  %v68_v24 = vrot.slane %v32_v12, 7 }
  0x79   :  { %v39_v15 = vsub.f32 %v31_v11, %v35_v13  ;;  %v40_v16 = vsub.f32 %v32_v12, %v36_v14  ;;  %v82_v33 = vsel %vm81_vm0, %v15_v4, %v67_v23  ;;  %v83_v34 = vsel %vm81_vm0, %v16_v5, %v68_v24 }
  0x7c   :  { %v46_v17 = vpop.permute.xlu0 %45 }
  0x7d   :  { %v48_v18 = vmul.f32 %v46_v17, %v39_v15  ;;  %v49_v19 = vmul.f32 %v46_v17, %v40_v16 }
  0x7f   :  { %v52_v20 = vrot.slane %v48_v18, 1  ;;  %v53_v21 = vrot.slane %v49_v19, 1  ;;  %v71_v27 = vrot.slane %v48_v18, 6  ;;  %v72_v28 = vrot.slane %v49_v19, 6 }
  0x81   :  { %v56_v25 = vsub.f32 %v48_v18, %v52_v20  ;;  %v57_v26 = vsub.f32 %v49_v19, %v53_v21  ;;  %v85_v35 = vsel %vm84_vm1, %v82_v33, %v71_v27  ;;  %v86_v36 = vsel %vm84_vm1, %v83_v34, %v72_v28 }
  0x83   :  { %v65_v29 = vmul.f32 %v63_v22, %v56_v25  ;;  %v66_v30 = vmul.f32 %v63_v22, %v57_v26 }
  0x85   :  { %v77_v31 = vrot.slane %v65_v29, 5  ;;  %v78_v32 = vrot.slane %v66_v30, 5 }
  0x87   :  { %v88_v37 = vsel %vm87_vm2, %v85_v35, %v77_v31  ;;  %v89_v38 = vsel %vm87_vm2, %v86_v36, %v78_v32 }
  0x88   :  { %172 = vmatpush.msk.msra.mxu0 %vm90_vm3, %v88_v37  ;;  %178 = vmatpush.msk.msra.mxu2 %vm90_vm3, %v88_v37 }
  0x89   :  { %175 = vmatpush.msk.msra.mxu1 %vm90_vm3, %v89_v38  ;;  %179 = vmatpush.msk.msra.mxu3 %vm90_vm3, %v89_v38 }
  0x8a   :  { %174 = vmatmul.msk.f32.vlgmr.msra.gmra.mxu2 %vm95_vm4, %v94_v39  ;;  %177 = vmatmul.msk.f32.vlgmr.msra.gmra.mxu3 %vm95_vm4, %v94_v39 }
  0x8b   :  { %173 = vmatmul.msk.f32.vlgmr.msra.gmra.mxu0 %vm95_vm4, %v93_v40  ;;  %176 = vmatmul.msk.f32.vlgmr.msra.gmra.mxu1 %vm95_vm4, %v93_v40 }
 0x108   :  { %v119_v41 = vpop.f32.mrf.mxu0  ;;  %v142_v42 = vpop.f32.mrf.mxu1 }
 0x109   :  { %148 = vst [vmem:[#allocation2] sm:$0xff] %v119_v41 }
 0x10a   :  { %149 = vst [vmem:[#allocation2 + $0x8] sm:$0xff] %v142_v42 }
 0x10d   :  { %v122_v43 = vpop.f32.mrf.mxu2  ;;  %v145_v44 = vpop.f32.mrf.mxu3 }
 0x10e   :  { %150 = vst [vmem:[#allocation2 + $0x10] sm:$0xff] %v122_v43 }
 0x10f   :  { %151 = vst [vmem:[#allocation2 + $0x18] sm:$0xff] %v145_v44 }
 0x110   :  { %164 = dma.vmem_to_hbm [thread:$0]  %s157_s25, 512, %s159_s28, [#allocation3], %s214_s1, %s214_s1, %s215_s29  }
 0x111   :  { %210 = dma.done.wait [#allocation3], 512  }
 0x112   :  { %211 = vsyncadd [#allocation3], 4294966784 }
 0x113   :  { %169 = vsyncpa [#allocation3], 1 }

</bundles_post_ra>
